<compile_context>
chip_gen: v7x
topology: tpu7x:2x2x1
jax: 0.10.0
libtpu: 0.0.40
codegen_flags: <defaults>
</compile_context>

<pallas_src>
import functools

import jax
import jax.numpy as jnp
from jax.experimental import pallas as pl
from jax.experimental.pallas import tpu as pltpu

_SUBLANE = 8    # f32 sublane tile height
_LANES = 128    # lane width


def _full_spec(shape):
    # Whole-array block (equal-to-full-dims satisfies the (8,128) rule).
    return pl.BlockSpec(shape, lambda: (0,) * len(shape))


def _round_up(n, m):
    return ((n + m - 1) // m) * m


# ------------------------------ fused kernel ---------------------------------

def _vae_fused_kernel(x_ref, ew1_ref, eb1_ref, ewh_ref, ebh_ref,
                      dw1_ref, db1_ref, dwo_ref, dbo_ref, eps_ref,
                      musig_ref, us_ref, loc_ref):
    """x:(Bp,Din) bf16; ew1:(Din,Hd) bf16; ewh:(Hd,HEADP) bf16 packed
    [Wmu|Wlv|0]; dw1:(L,Hd) bf16; dwo:(Hd,Dout) bf16; biases f32;
    eps:(K,Bp,L) f32.
    Outputs: musig:(Bp,HEADP) f32 packed [mu|sigma|pad] (one full-width store),
             us:(K,Bp,L) f32, loc:(K,Bp,Dout) bf16."""
    K, Bp, L = eps_ref.shape
    Dout = loc_ref.shape[-1]

    # ---- encoder: bf16 MXU inputs, f32 accumulation, f32 elementwise ----
    h = jnp.dot(x_ref[...], ew1_ref[...], preferred_element_type=jnp.float32)
    h = jnp.maximum(h + eb1_ref[...], 0.0)                         # ReLU (f32)
    head = jnp.dot(h.astype(jnp.bfloat16), ewh_ref[...],
                   preferred_element_type=jnp.float32) + ebh_ref[...]  # (Bp, HEADP)

    # ---- pack [mu | sigma | pad]: single lane-dense store, exp once (EUP) ----
    lane = jax.lax.broadcasted_iota(jnp.int32, head.shape, 1)
    is_sigma = (lane >= L) & (lane < 2 * L)
    musig = jnp.where(is_sigma, jnp.exp(0.5 * head), head)
    musig_ref[...] = musig

    mu = musig[:, :L]                                              # (Bp, L)
    sigma = musig[:, L:2 * L]                                      # (Bp, L)

    # ---- reparameterized sample: one VPU FMA over the whole (K,Bp,L) tile ----
    us3 = mu[None] + sigma[None] * eps_ref[...]                    # (K, Bp, L)
    us_ref[...] = us3
    us_2d = us3.reshape(K * Bp, L)                                 # layout-free (Bp%8==0)

    # ---- decoder (K draws folded into matmul rows) ----
    h2 = jnp.dot(us_2d.astype(jnp.bfloat16), dw1_ref[...],
                 preferred_element_type=jnp.float32)
    h2 = jnp.maximum(h2 + db1_ref[...], 0.0)
    logits = jnp.dot(h2.astype(jnp.bfloat16), dwo_ref[...],
                     preferred_element_type=jnp.float32) + dbo_ref[...]
    loc = jax.nn.sigmoid(logits)                                   # f32 elementwise
    loc_ref[...] = loc.reshape(K, Bp, Dout).astype(jnp.bfloat16)   # bf16 writeback


# ------------------------------ host wrapper ----------------------------------

@functools.partial(jax.jit, static_argnames=("K",))
def vae_forward(x, params, eps, K):
    """x: (B, C, H, W) float32 NCHW.  eps: (K, B, L) float32 standard-normal.
    Returns ((mu, sigma), (loc, scale), us) — the parameter tensors of
    qu_x = Normal(mu, sigma) and px_u = Normal(loc, 0.75)."""
    B = x.shape[0]
    x_flat = x.reshape(B, -1)                                      # flatten NCHW
    Din = x_flat.shape[1]
    Hd = params["enc_w1"].shape[1]
    L = eps.shape[-1]
    HEADP = params["enc_w_head"].shape[1]                          # 128-lane padded head
    Dout = params["dec_wo"].shape[1]

    # pad rows to a sublane multiple so the matmuls use whole (8,128) tiles
    Bp = _round_up(B, _SUBLANE)
    pad = Bp - B
    x_p = jnp.pad(x_flat, ((0, pad), (0, 0))).astype(jnp.bfloat16)
    eps_p = jnp.pad(eps, ((0, 0), (0, pad), (0, 0))).astype(jnp.float32)

    flops = 2 * (Bp * Din * Hd + Bp * Hd * HEADP
                 + K * Bp * L * Hd + K * Bp * Hd * Dout)
    transcendentals = Bp * HEADP + K * Bp * Dout                   # exp + sigmoid
    bytes_accessed = (
        Bp * Din * 2 + Din * Hd * 2 + Hd * 4 + Hd * HEADP * 2 + HEADP * 4
        + L * Hd * 2 + Hd * 4 + Hd * Dout * 2 + Dout * 4
        + K * Bp * L * 4                                           # eps in
        + Bp * HEADP * 4 + K * Bp * L * 4 + K * Bp * Dout * 2)     # outputs

    musig, us, loc = pl.pallas_call(
        _vae_fused_kernel,
        out_shape=(jax.ShapeDtypeStruct((Bp, HEADP), jnp.float32),
                   jax.ShapeDtypeStruct((K, Bp, L), jnp.float32),
                   jax.ShapeDtypeStruct((K, Bp, Dout), jnp.bfloat16)),
        in_specs=[_full_spec((Bp, Din)),
                  _full_spec((Din, Hd)), _full_spec((1, Hd)),
                  _full_spec((Hd, HEADP)), _full_spec((1, HEADP)),
                  _full_spec((L, Hd)), _full_spec((1, Hd)),
                  _full_spec((Hd, Dout)), _full_spec((1, Dout)),
                  _full_spec((K, Bp, L))],
        out_specs=(_full_spec((Bp, HEADP)),
                   _full_spec((K, Bp, L)),
                   _full_spec((K, Bp, Dout))),
        compiler_params=pltpu.CompilerParams(
            vmem_limit_bytes=32 * 1024 * 1024),
        cost_estimate=pl.CostEstimate(flops=flops,
                                      transcendentals=transcendentals,
                                      bytes_accessed=bytes_accessed),
    )(x_p, params["enc_w1"], params["enc_b1"],
      params["enc_w_head"], params["enc_b_head"],
      params["dec_w1"], params["dec_b1"],
      params["dec_wo"], params["dec_bo"], eps_p)

    mu = musig[:B, :L]
    sigma = musig[:B, L:2 * L]
    if pad:                                                        # static under jit
        us = us[:, :B, :]
        loc = loc[:, :B, :]

    qu_x_params = (mu, sigma)                                      # Normal(mu, sigma)
    px_u_params = (loc, jnp.asarray(0.75, jnp.float32))            # Normal(loc, 0.75)
    # TODO(synk): torch.distributions objects themselves have no Pallas
    # equivalent; we return their parameter tensors instead.
    return qu_x_params, px_u_params, us


def init_params(key, d_in, hidden, latent):
    ks = jax.random.split(key, 5)
    s1 = 1.0 / jnp.sqrt(d_in)
    s2 = 1.0 / jnp.sqrt(hidden)
    s3 = 1.0 / jnp.sqrt(latent)
    headp = _round_up(2 * latent, _LANES)                          # 128-lane padded head
    wmu = jax.random.normal(ks[1], (hidden, latent), jnp.float32) * s2
    wlv = jax.random.normal(ks[2], (hidden, latent), jnp.float32) * s2
    w_head = jnp.concatenate([wmu, wlv], axis=1)                   # [W_mu | W_logvar]
    w_head = jnp.pad(w_head, ((0, 0), (0, headp - 2 * latent)))    # zero pad to 128
    return {
        # weights in bf16 (MXU input dtype, half the weight DMA); biases f32
        "enc_w1": (jax.random.normal(ks[0], (d_in, hidden), jnp.float32) * s1
                   ).astype(jnp.bfloat16),
        "enc_b1": jnp.zeros((1, hidden), jnp.float32),
        "enc_w_head": w_head.astype(jnp.bfloat16),
        "enc_b_head": jnp.zeros((1, headp), jnp.float32),
        "dec_w1": (jax.random.normal(ks[3], (latent, hidden), jnp.float32) * s3
                   ).astype(jnp.bfloat16),
        "dec_b1": jnp.zeros((1, hidden), jnp.float32),
        "dec_wo": (jax.random.normal(ks[4], (hidden, d_in), jnp.float32) * s2
                   ).astype(jnp.bfloat16),
        "dec_bo": jnp.zeros((1, d_in), jnp.float32),
    }


def _reference_forward(x, params, eps, K):
    """Pure-JAX reference with the same mixed precision as the kernel."""
    B = x.shape[0]
    L = eps.shape[-1]
    xf = x.reshape(B, -1).astype(jnp.bfloat16).astype(jnp.float32)
    f32 = lambda a: a.astype(jnp.float32)
    h = jnp.maximum(xf @ f32(params["enc_w1"]) + params["enc_b1"], 0.0)
    head = (h.astype(jnp.bfloat16).astype(jnp.float32) @ f32(params["enc_w_head"])
            + params["enc_b_head"])
    mu, lv = head[:, :L], head[:, L:2 * L]
    sigma = jnp.exp(0.5 * lv)
    us = mu[None] + sigma[None] * eps                              # (K, B, L)
    u2 = us.reshape(K * B, L).astype(jnp.bfloat16).astype(jnp.float32)
    h2 = jnp.maximum(u2 @ f32(params["dec_w1"]) + params["dec_b1"], 0.0)
    logits = (h2.astype(jnp.bfloat16).astype(jnp.float32) @ f32(params["dec_wo"])
              + params["dec_bo"])
    loc = jax.nn.sigmoid(logits).reshape(K, B, -1)
    return mu, sigma, us, loc


if __name__ == "__main__":
    key = jax.random.PRNGKey(0)
    k_x, k_p, k_eps = jax.random.split(key, 3)

    B, C, H, W = 2, 4, 16, 16          # NCHW input, like the PyTorch module
    hidden, latent, K = 128, 32, 2
    d_in = C * H * W

    x = jax.random.normal(k_x, (B, C, H, W), jnp.float32)
    params = init_params(k_p, d_in, hidden, latent)
    eps = jax.random.normal(k_eps, (K, B, latent), jnp.float32)

    (mu, sigma), (loc, scale), us = vae_forward(x, params, eps, K)
    jax.block_until_ready((mu, sigma, loc, scale, us))

    assert mu.shape == (B, latent) and sigma.shape == (B, latent)
    assert us.shape == (K, B, latent)
    assert loc.shape == (K, B, d_in) and scale.shape == ()
    assert loc.dtype == jnp.bfloat16
    loc_f32 = loc.astype(jnp.float32)
    assert bool(jnp.all(jnp.isfinite(mu))) and bool(jnp.all(jnp.isfinite(sigma)))
    assert bool(jnp.all(jnp.isfinite(loc_f32))) and bool(jnp.all(jnp.isfinite(us)))

    # numerical sanity check against a pure-JAX reference (same mixed precision)
    r_mu, r_sigma, r_us, r_loc = _reference_forward(x, params, eps, K)
    assert bool(jnp.allclose(mu, r_mu, atol=2e-3, rtol=2e-3))
    assert bool(jnp.allclose(sigma, r_sigma, atol=2e-3, rtol=2e-3))
    assert bool(jnp.allclose(us, r_us, atol=2e-3, rtol=2e-3))
    assert bool(jnp.allclose(loc_f32, r_loc, atol=4e-3, rtol=4e-3))  # bf16 writeback
    print("KERNEL_OK")
</pallas_src>

<mosaic_0001>
module attributes {stable_mosaic.version = 11 : i64} {
  func.func @_vae_fused_kernel(%arg0: memref<8x1024xbf16, #tpu.memory_space<vmem>>, %arg1: memref<1024x128xbf16, #tpu.memory_space<vmem>>, %arg2: memref<1x128xf32, #tpu.memory_space<vmem>>, %arg3: memref<128x128xbf16, #tpu.memory_space<vmem>>, %arg4: memref<1x128xf32, #tpu.memory_space<vmem>>, %arg5: memref<32x128xbf16, #tpu.memory_space<vmem>>, %arg6: memref<1x128xf32, #tpu.memory_space<vmem>>, %arg7: memref<128x1024xbf16, #tpu.memory_space<vmem>>, %arg8: memref<1x1024xf32, #tpu.memory_space<vmem>>, %arg9: memref<2x8x32xf32, #tpu.memory_space<vmem>>, %arg10: memref<8x128xf32, #tpu.memory_space<vmem>>, %arg11: memref<2x8x32xf32, #tpu.memory_space<vmem>>, %arg12: memref<2x8x1024xbf16, #tpu.memory_space<vmem>>) attributes {dimension_semantics = [], scalar_prefetch = 0 : i64, scratch_operands = 0 : i64, tpu.core_type = #tpu.core_type<tc>} {
    %c0 = arith.constant 0 : index
    %c0_0 = arith.constant 0 : index
    %0 = vector.load %arg0[%c0, %c0_0] : memref<8x1024xbf16, #tpu.memory_space<vmem>>, vector<8x1024xbf16>
    %c0_1 = arith.constant 0 : index
    %c0_2 = arith.constant 0 : index
    %1 = vector.load %arg1[%c0_1, %c0_2] : memref<1024x128xbf16, #tpu.memory_space<vmem>>, vector<1024x128xbf16>
    %cst = arith.constant dense<0.000000e+00> : vector<8x128xf32>
    %2 = tpu.matmul %0, %1, %cst {dimension_numbers = #tpu.dot_dimension_numbers<[1], [0], [0], [1], [0, 0, 1, 1], [], []>} : vector<8x1024xbf16>, vector<1024x128xbf16>, vector<8x128xf32> -> vector<8x128xf32>
    %c0_3 = arith.constant 0 : index
    %c0_4 = arith.constant 0 : index
    %3 = vector.load %arg2[%c0_3, %c0_4] : memref<1x128xf32, #tpu.memory_space<vmem>>, vector<1x128xf32>
    %4 = vector.broadcast %3 : vector<1x128xf32> to vector<8x128xf32>
    %5 = arith.addf %2, %4 : vector<8x128xf32>
    %cst_5 = arith.constant 0.000000e+00 : f32
    %6 = vector.broadcast %cst_5 : f32 to vector<8x128xf32>
    %7 = arith.maximumf %5, %6 : vector<8x128xf32>
    %8 = arith.truncf %7 : vector<8x128xf32> to vector<8x128xbf16>
    %c0_6 = arith.constant 0 : index
    %c0_7 = arith.constant 0 : index
    %9 = vector.load %arg3[%c0_6, %c0_7] : memref<128x128xbf16, #tpu.memory_space<vmem>>, vector<128x128xbf16>
    %cst_8 = arith.constant dense<0.000000e+00> : vector<8x128xf32>
    %10 = tpu.matmul %8, %9, %cst_8 {dimension_numbers = #tpu.dot_dimension_numbers<[1], [0], [0], [1], [0, 0, 1, 1], [], []>} : vector<8x128xbf16>, vector<128x128xbf16>, vector<8x128xf32> -> vector<8x128xf32>
    %c0_9 = arith.constant 0 : index
    %c0_10 = arith.constant 0 : index
    %11 = vector.load %arg4[%c0_9, %c0_10] : memref<1x128xf32, #tpu.memory_space<vmem>>, vector<1x128xf32>
    %12 = vector.broadcast %11 : vector<1x128xf32> to vector<8x128xf32>
    %13 = arith.addf %10, %12 : vector<8x128xf32>
    %14 = tpu.iota {dimensions = array<i32: 1>} : vector<8x128xi32>
    %c32_i32 = arith.constant 32 : i32
    %15 = vector.broadcast %c32_i32 : i32 to vector<8x128xi32>
    %16 = arith.cmpi sge, %14, %15 : vector<8x128xi32>
    %c64_i32 = arith.constant 64 : i32
    %17 = vector.broadcast %c64_i32 : i32 to vector<8x128xi32>
    %18 = arith.cmpi slt, %14, %17 : vector<8x128xi32>
    %19 = arith.andi %16, %18 : vector<8x128xi1>
    %cst_11 = arith.constant 5.000000e-01 : f32
    %20 = vector.broadcast %cst_11 : f32 to vector<8x128xf32>
    %21 = arith.mulf %20, %13 : vector<8x128xf32>
    %22 = math.exp %21 : vector<8x128xf32>
    %23 = arith.select %19, %22, %13 : vector<8x128xi1>, vector<8x128xf32>
    %c0_12 = arith.constant 0 : index
    %c0_13 = arith.constant 0 : index
    %24 = vector.load %arg10[%c0_12, %c0_13] : memref<8x128xf32, #tpu.memory_space<vmem>>, vector<8x128xf32>
    tpu.vector_store %arg10[%c0_12, %c0_13], %23 {strides = array<i32>} : memref<8x128xf32, #tpu.memory_space<vmem>>, vector<8x128xf32>,
    %25 = vector.extract_strided_slice %23 {offsets = [0, 0], sizes = [8, 32], strides = [1, 1]} : vector<8x128xf32> to vector<8x32xf32>
    %26 = vector.extract_strided_slice %23 {offsets = [0, 32], sizes = [8, 32], strides = [1, 1]} : vector<8x128xf32> to vector<8x32xf32>
    %27 = vector.shape_cast %25 : vector<8x32xf32> to vector<1x8x32xf32>
    %28 = vector.shape_cast %26 : vector<8x32xf32> to vector<1x8x32xf32>
    %c0_14 = arith.constant 0 : index
    %c0_15 = arith.constant 0 : index
    %c0_16 = arith.constant 0 : index
    %29 = vector.load %arg9[%c0_14, %c0_15, %c0_16] : memref<2x8x32xf32, #tpu.memory_space<vmem>>, vector<2x8x32xf32>
    %30 = vector.broadcast %28 : vector<1x8x32xf32> to vector<2x8x32xf32>
    %31 = arith.mulf %30, %29 : vector<2x8x32xf32>
    %32 = vector.broadcast %27 : vector<1x8x32xf32> to vector<2x8x32xf32>
    %33 = arith.addf %32, %31 : vector<2x8x32xf32>
    %c0_17 = arith.constant 0 : index
    %c0_18 = arith.constant 0 : index
    %c0_19 = arith.constant 0 : index
    %34 = vector.load %arg11[%c0_17, %c0_18, %c0_19] : memref<2x8x32xf32, #tpu.memory_space<vmem>>, vector<2x8x32xf32>
    tpu.vector_store %arg11[%c0_17, %c0_18, %c0_19], %33 {strides = array<i32>} : memref<2x8x32xf32, #tpu.memory_space<vmem>>, vector<2x8x32xf32>,
    %35 = vector.shape_cast %33 : vector<2x8x32xf32> to vector<16x32xf32>
    %36 = arith.truncf %35 : vector<16x32xf32> to vector<16x32xbf16>
    %c0_20 = arith.constant 0 : index
    %c0_21 = arith.constant 0 : index
    %37 = vector.load %arg5[%c0_20, %c0_21] : memref<32x128xbf16, #tpu.memory_space<vmem>>, vector<32x128xbf16>
    %cst_22 = arith.constant dense<0.000000e+00> : vector<16x128xf32>
    %38 = tpu.matmul %36, %37, %cst_22 {dimension_numbers = #tpu.dot_dimension_numbers<[1], [0], [0], [1], [0, 0, 1, 1], [], []>} : vector<16x32xbf16>, vector<32x128xbf16>, vector<16x128xf32> -> vector<16x128xf32>
    %c0_23 = arith.constant 0 : index
    %c0_24 = arith.constant 0 : index
    %39 = vector.load %arg6[%c0_23, %c0_24] : memref<1x128xf32, #tpu.memory_space<vmem>>, vector<1x128xf32>
    %40 = vector.broadcast %39 : vector<1x128xf32> to vector<16x128xf32>
    %41 = arith.addf %38, %40 : vector<16x128xf32>
    %cst_25 = arith.constant 0.000000e+00 : f32
    %42 = vector.broadcast %cst_25 : f32 to vector<16x128xf32>
    %43 = arith.maximumf %41, %42 : vector<16x128xf32>
    %44 = arith.truncf %43 : vector<16x128xf32> to vector<16x128xbf16>
    %c0_26 = arith.constant 0 : index
    %c0_27 = arith.constant 0 : index
    %45 = vector.load %arg7[%c0_26, %c0_27] : memref<128x1024xbf16, #tpu.memory_space<vmem>>, vector<128x1024xbf16>
    %cst_28 = arith.constant dense<0.000000e+00> : vector<16x1024xf32>
    %46 = tpu.matmul %44, %45, %cst_28 {dimension_numbers = #tpu.dot_dimension_numbers<[1], [0], [0], [1], [0, 0, 1, 1], [], []>} : vector<16x128xbf16>, vector<128x1024xbf16>, vector<16x1024xf32> -> vector<16x1024xf32>
    %c0_29 = arith.constant 0 : index
    %c0_30 = arith.constant 0 : index
    %47 = vector.load %arg8[%c0_29, %c0_30] : memref<1x1024xf32, #tpu.memory_space<vmem>>, vector<1x1024xf32>
    %48 = vector.broadcast %47 : vector<1x1024xf32> to vector<16x1024xf32>
    %49 = arith.addf %46, %48 : vector<16x1024xf32>
    %50 = arith.negf %49 : vector<16x1024xf32>
    %51 = math.exp %50 : vector<16x1024xf32>
    %cst_31 = arith.constant 1.000000e+00 : f32
    %52 = vector.broadcast %cst_31 : f32 to vector<16x1024xf32>
    %53 = arith.addf %52, %51 : vector<16x1024xf32>
    %54 = arith.divf %52, %53 : vector<16x1024xf32>
    %55 = vector.shape_cast %54 : vector<16x1024xf32> to vector<2x8x1024xf32>
    %56 = arith.truncf %55 : vector<2x8x1024xf32> to vector<2x8x1024xbf16>
    %c0_32 = arith.constant 0 : index
    %c0_33 = arith.constant 0 : index
    %c0_34 = arith.constant 0 : index
    %57 = vector.load %arg12[%c0_32, %c0_33, %c0_34] : memref<2x8x1024xbf16, #tpu.memory_space<vmem>>, vector<2x8x1024xbf16>
    tpu.vector_store %arg12[%c0_32, %c0_33, %c0_34], %56 {strides = array<i32>} : memref<2x8x1024xbf16, #tpu.memory_space<vmem>>, vector<2x8x1024xbf16>,
    return
  }
}

</mosaic_0001>

<bundles_post_ra>
// kernel: vae_forward.1
= control target key start
LH: loop header
LB: loop body
LE: loop exit
PB: predicated region body
PF: predicated region fallthrough
CT: control target
= control target key end

     0   :  { %18 = vsyncpa [#allocation3], 0  ;;  %s2536_s0 = inlined_call_operand.vmem [shape: bf16[8,1024], index: 0, kind: input, shape index: {}]   ;;  %s2537_s1 = inlined_call_operand.hbm [shape: bf16[1024,128], index: 1, kind: input, shape index: {}]   ;;  %s2538_s2 = inlined_call_operand.vmem [shape: f32[1,128], index: 2, kind: input, shape index: {}]   ;;  %s2539_s3 = inlined_call_operand.vmem [shape: bf16[128,128], index: 3, kind: input, shape index: {}]   ;;  %s2540_s4 = inlined_call_operand.vmem [shape: f32[1,128], index: 4, kind: input, shape index: {}]   ;;  %s2541_s5 = inlined_call_operand.vmem [shape: bf16[32,128], index: 5, kind: input, shape index: {}]   ;;  %s2542_s6 = inlined_call_operand.vmem [shape: f32[1,128], index: 6, kind: input, shape index: {}]   ;;  %s2543_s7 = inlined_call_operand.hbm [shape: bf16[128,1024], index: 7, kind: input, shape index: {}]   ;;  %s2544_s8 = inlined_call_operand.vmem [shape: f32[1,1024], index: 8, kind: input, shape index: {}]   ;;  %s2545_s9 = inlined_call_operand.vmem [shape: f32[2,8,32], index: 9, kind: input, shape index: {}]   ;;  %s2546_s10 = inlined_call_operand.vmem [shape: f32[8,128], index: 10, kind: output, shape index: {0}]   ;;  %s2547_s11 = inlined_call_operand.vmem [shape: f32[2,8,32], index: 11, kind: output, shape index: {1}]   ;;  %s2548_s12 = inlined_call_operand.vmem [shape: bf16[2,8,1024], index: 12, kind: output, shape index: {2}]  }
   0x1   :  { %19 = vsyncpa [#allocation5], 0  ;;  %s2293_s21 = smov [#allocation2]   ;;  %s2245_s25 = scalar_lea.hbm %s2537_s1, 8192 }
   0x2   :  { %s27_s22 = sshll.u32 %s2293_s21, 4  ;;  %p2246_p0 = scmp.ne.s32.totalorder %s2537_s1, %s2245_s25  ;;  %s28_s22 = int_to_ptr.vmem [resolvable:$true] %s27_s22 }
   0x3   :  { %p2249_p1 = scmp.lt.u32.totalorder %s2245_s25, %s2537_s1 }
   0x5   :  { %p2251_p2 = pnand %p2249_p1, %p2246_p0 }
   0x7   :  { %2254 = shalt.err (!%p2251_p2)
}
   0x8   :  { %s2255_s30 = scalar_lea.vmem %s28_s22, 8192  ;;  %p2260_p4 = scmp.lt.s32.totalorder %s28_s22, %s28_s22 }
   0x9   :  { %p2256_p3 = scmp.ne.s32.totalorder %s28_s22, %s2255_s30  ;;  %p2261_p5 = scmp.lt.s32.totalorder %s2255_s30, %s2255_s30 }
   0xb   :  { %p2262_p6 = por %p2261_p5, %p2260_p4 }
   0xd   :  { %p2263_p7 = pnand %p2262_p6, %p2256_p3 }
   0xf   :  { %2266 = shalt.err (!%p2263_p7)
}
  0x10   :  { %s2294_s13 = smov 64   ;;  %s2295_s14 = smov 4  }
  0x11   :  { %33 = dma.hbm_to_vmem [thread:$0]  %s2537_s1, 8192, %s28_s22, [#allocation3], %s2294_s13, %s2294_s13, %s2295_s14  }
  0x12   :  { %s2296_s17 = smov [#allocation4]   ;;  %s2267_s21 = scalar_lea.hbm %s2543_s7, 8192 }
  0x13   :  { %s49_s18 = sshll.u32 %s2296_s17, 4  ;;  %p2268_p8 = scmp.ne.s32.totalorder %s2543_s7, %s2267_s21  ;;  %s50_s18 = int_to_ptr.vmem [resolvable:$true] %s49_s18 }
  0x14   :  { %p2271_p9 = scmp.lt.u32.totalorder %s2267_s21, %s2543_s7 }
  0x16   :  { %p2273_p10 = pnand %p2271_p9, %p2268_p8 }
  0x18   :  { %2276 = shalt.err (!%p2273_p10)
}
  0x19   :  { %s2277_s27 = scalar_lea.vmem %s50_s18, 8192  ;;  %p2282_p12 = scmp.lt.s32.totalorder %s50_s18, %s50_s18 }
  0x1a   :  { %p2278_p11 = scmp.ne.s32.totalorder %s50_s18, %s2277_s27  ;;  %p2283_p13 = scmp.lt.s32.totalorder %s2277_s27, %s2277_s27 }
  0x1c   :  { %p2284_p0 = por %p2283_p13, %p2282_p12 }
  0x1e   :  { %p2285_p1 = pnand %p2284_p0, %p2278_p11 }
  0x20   :  { %2288 = shalt.err (!%p2285_p1)
}
  0x21   :  { %s2297_s1 = smov 512   ;;  %s2298_s22 = smov 32  }
  0x22   :  { %55 = dma.hbm_to_vmem [thread:$0]  %s2543_s7, 8192, %s50_s18, [#allocation5], %s2297_s1, %s2297_s1, %s2298_s22  }
  0x23   :  { %2289 = dma.done.wait [#allocation3], 8192  }
  0x24   :  { %2290 = vsyncadd [#allocation3], 4294959104 }
  0x25   :  { %2291 = dma.done.wait [#allocation5], 8192  }
  0x26   :  { %2292 = vsyncadd [#allocation5], 4294959104  ;;  %v2097_v0 = vld [vmem:[#allocation2 + $0x40] sm:$0xff]   ;;  %v2101_v4 = vld [vmem:[#allocation2 + $0x48] sm:$0xff]   ;;  %vm2300_vm0 = vmmov 0   ;;  %s2301_s23 = smov 96  }
  0x27   :  { %v2098_v1 = vld [vmem:[#allocation2 + $0xc0] sm:$0xff]   ;;  %1959 = vmatprep.subr.bf16.mxu0 %v2097_v0  ;;  %v2102_v5 = vld [vmem:[#allocation2 + $0xc8] sm:$0xff]   ;;  %v2105_v8 = vld [vmem:[#allocation2 + $0x50] sm:$0xff]   ;;  %vm923_vm4 = vcmask 261120  }
  0x28   :  { %v2099_v2 = vld [vmem:[#allocation2] sm:$0xff]   ;;  %1981 = vmatprep.subr.bf16.mxu1 %v2098_v1  ;;  %v2103_v6 = vld [vmem:[#allocation2 + $0x8] sm:$0xff]   ;;  %v2106_v9 = vld [vmem:[#allocation2 + $0xd0] sm:$0xff]  }
  0x29   :  { %v2100_v3 = vld [vmem:[#allocation2 + $0x80] sm:$0xff]   ;;  %1960 = vmatpush3.bf16.msra.mxu0 %v2099_v2  ;;  %v2104_v7 = vld [vmem:[#allocation2 + $0x88] sm:$0xff]   ;;  %v2107_v10 = vld [vmem:[#allocation2 + $0x10] sm:$0xff]  }
  0x2a   :  { %1982 = vmatpush3.bf16.msra.mxu1 %v2100_v3  ;;  %1961 = vmatprep.subr.bf16.mxu0 %v2101_v4  ;;  %v2108_v11 = vld [vmem:[#allocation2 + $0x90] sm:$0xff]   ;;  %v2109_v12 = vld [vmem:[#allocation2 + $0x58] sm:$0xff]   ;;  %v2113_v16 = vld [vmem:[#allocation2 + $0x60] sm:$0xff]  }
  0x2b   :  { %1983 = vmatprep.subr.bf16.mxu1 %v2102_v5  ;;  %v2110_v13 = vld [vmem:[#allocation2 + $0xd8] sm:$0xff]   ;;  %v2114_v17 = vld [vmem:[#allocation2 + $0xe0] sm:$0xff]   ;;  %v2117_v20 = vld [vmem:[#allocation2 + $0x68] sm:$0xff]  }
  0x2c   :  { %v2111_v14 = vld [vmem:[#allocation2 + $0x18] sm:$0xff]   ;;  %v2115_v18 = vld [vmem:[#allocation2 + $0x20] sm:$0xff]   ;;  %v2118_v21 = vld [vmem:[#allocation2 + $0xe8] sm:$0xff]  }
  0x2d   :  { %1962 = vmatpush3.bf16.msra.mxu0 %v2103_v6  ;;  %v2112_v15 = vld [vmem:[#allocation2 + $0x98] sm:$0xff]   ;;  %v2116_v19 = vld [vmem:[#allocation2 + $0xa0] sm:$0xff]   ;;  %v2119_v22 = vld [vmem:[#allocation2 + $0x28] sm:$0xff]  }
  0x2e   :  { %1984 = vmatpush3.bf16.msra.mxu1 %v2104_v7  ;;  %1963 = vmatprep.subr.bf16.mxu0 %v2105_v8  ;;  %v2120_v23 = vld [vmem:[#allocation2 + $0xa8] sm:$0xff]   ;;  %v2121_v24 = vld [vmem:[#allocation2 + $0x70] sm:$0xff]   ;;  %v2125_v28 = vld [vmem:[#allocation2 + $0x78] sm:$0xff]  }
  0x2f   :  { %1985 = vmatprep.subr.bf16.mxu1 %v2106_v9  ;;  %v2122_v25 = vld [vmem:[#allocation2 + $0xf0] sm:$0xff]   ;;  %v2126_v29 = vld [vmem:[#allocation2 + $0xf8] sm:$0xff]   ;;  %v67_v32 = vld [vmem:[%s2536_s0] sm:$0xff] }
  0x30   :  { %v2123_v26 = vld [vmem:[#allocation2 + $0x30] sm:$0xff]   ;;  %v2127_v30 = vld [vmem:[#allocation2 + $0x38] sm:$0xff]   ;;  %v68_v33 = vld [vmem:[%s2536_s0 + $0x8] sm:$0xff]  ;;  %v1778_v34 = vcombine.low %v67_v32, %v67_v32  ;;  %v1779_v35 = vcombine.high %v67_v32, %v67_v32 }
  0x31   :  { %1964 = vmatpush3.bf16.msra.mxu0 %v2107_v10  ;;  %v2124_v27 = vld [vmem:[#allocation2 + $0xb0] sm:$0xff]   ;;  %v2128_v31 = vld [vmem:[#allocation2 + $0xb8] sm:$0xff]   ;;  %v1780_v36 = vcombine.low %v68_v33, %v68_v33  ;;  %v1781_v37 = vcombine.high %v68_v33, %v68_v33  ;;  %v2133_v38 = vld [vmem:[#allocation2 + $0x140] sm:$0xff]  }
  0x32   :  { %1986 = vmatpush3.bf16.msra.mxu1 %v2108_v11  ;;  %1965 = vmatprep.subr.bf16.mxu0 %v2109_v12  ;;  %v2134_v39 = vld [vmem:[#allocation2 + $0x1c0] sm:$0xff]   ;;  %v2137_v42 = vld [vmem:[#allocation2 + $0x148] sm:$0xff]   ;;  %v2141_v46 = vld [vmem:[#allocation2 + $0x150] sm:$0xff]  }
  0x33   :  { %1987 = vmatprep.subr.bf16.mxu1 %v2110_v13  ;;  %650 = vmatprep.mubr.bf16.mxu0 %v1779_v35  ;;  %v2135_v40 = vld [vmem:[#allocation2 + $0x100] sm:$0xff]   ;;  %v2138_v43 = vld [vmem:[#allocation2 + $0x1c8] sm:$0xff]   ;;  %v2142_v47 = vld [vmem:[#allocation2 + $0x1d0] sm:$0xff]   ;;  %v2299_v13 = vmov 0.0  }
  0x34   :  { %690 = vmatprep.mubr.bf16.mxu1 %v1781_v37  ;;  %v2136_v41 = vld [vmem:[#allocation2 + $0x180] sm:$0xff]   ;;  %v2139_v44 = vld [vmem:[#allocation2 + $0x108] sm:$0xff]   ;;  %v2143_v48 = vld [vmem:[#allocation2 + $0x110] sm:$0xff]  }
  0x35   :  { %1966 = vmatpush3.bf16.msra.mxu0 %v2111_v14  ;;  %v2140_v45 = vld [vmem:[#allocation2 + $0x188] sm:$0xff]   ;;  %v2144_v49 = vld [vmem:[#allocation2 + $0x190] sm:$0xff]   ;;  %v2145_v50 = vld [vmem:[#allocation2 + $0x158] sm:$0xff]  }
  0x36   :  { %1988 = vmatpush3.bf16.msra.mxu1 %v2112_v15  ;;  %1967 = vmatprep.subr.bf16.mxu0 %v2113_v16  ;;  %v2146_v51 = vld [vmem:[#allocation2 + $0x1d8] sm:$0xff]   ;;  %v2149_v54 = vld [vmem:[#allocation2 + $0x160] sm:$0xff]   ;;  %v2153_v58 = vld [vmem:[#allocation2 + $0x168] sm:$0xff]  }
  0x37   :  { %1989 = vmatprep.subr.bf16.mxu1 %v2114_v17  ;;  %v2147_v52 = vld [vmem:[#allocation2 + $0x118] sm:$0xff]   ;;  %v2150_v55 = vld [vmem:[#allocation2 + $0x1e0] sm:$0xff]   ;;  %v2154_v59 = vld [vmem:[#allocation2 + $0x1e8] sm:$0xff]  }
  0x38   :  { %v2148_v53 = vld [vmem:[#allocation2 + $0x198] sm:$0xff]   ;;  %v2151_v56 = vld [vmem:[#allocation2 + $0x120] sm:$0xff]   ;;  %v2155_v60 = vld [vmem:[#allocation2 + $0x128] sm:$0xff]  }
  0x39   :  { %1968 = vmatpush3.bf16.msra.mxu0 %v2115_v18  ;;  %v2152_v57 = vld [vmem:[#allocation2 + $0x1a0] sm:$0xff]   ;;  %v2156_v61 = vld [vmem:[#allocation2 + $0x1a8] sm:$0xff]   ;;  %v2157_v62 = vld [vmem:[#allocation2 + $0x170] sm:$0xff]  }
  0x3a   :  { %1990 = vmatpush3.bf16.msra.mxu1 %v2116_v19  ;;  %1969 = vmatprep.subr.bf16.mxu0 %v2117_v20  ;;  %v2158_v63 = vld [vmem:[#allocation2 + $0x1f0] sm:$0xff]   ;;  %v2161_v2 = vld [vmem:[#allocation2 + $0x178] sm:$0xff]   ;;  %v2169_v12 = vld [vmem:[%s2539_s3] sm:$0xff]  }
  0x3b   :  { %1991 = vmatprep.subr.bf16.mxu1 %v2118_v21  ;;  %v2159_v0 = vld [vmem:[#allocation2 + $0x130] sm:$0xff]   ;;  %v2162_v3 = vld [vmem:[#allocation2 + $0x1f8] sm:$0xff]   ;;  %v2170_v14 = vld [vmem:[%s2539_s3 + $0x8] sm:$0xff]  }
  0x3c   :  { %v2160_v1 = vld [vmem:[#allocation2 + $0x1b0] sm:$0xff]   ;;  %v2163_v4 = vld [vmem:[#allocation2 + $0x138] sm:$0xff]   ;;  %v2173_v17 = vld [vmem:[%s2539_s3 + $0x20] sm:$0xff]  }
  0x3d   :  { %1970 = vmatpush3.bf16.msra.mxu0 %v2119_v22  ;;  %v2164_v5 = vld [vmem:[#allocation2 + $0x1b8] sm:$0xff]   ;;  %v69_v6 = vld [vmem:[%s2536_s0 + $0x10] sm:$0xff]  ;;  %v2174_v18 = vld [vmem:[%s2539_s3 + $0x28] sm:$0xff]  }
  0x3e   :  { %1992 = vmatpush3.bf16.msra.mxu1 %v2120_v23  ;;  %1971 = vmatprep.subr.bf16.mxu0 %v2121_v24  ;;  %v1782_v7 = vcombine.low %v69_v6, %v69_v6  ;;  %v1783_v8 = vcombine.high %v69_v6, %v69_v6  ;;  %v70_v9 = vld [vmem:[%s2536_s0 + $0x18] sm:$0xff]  ;;  %v2171_v15 = vld [vmem:[%s2539_s3 + $0x10] sm:$0xff]   ;;  %v901_v21 = vld [vmem:[%s2545_s9] sm:$0xff] }
  0x3f   :  { %1993 = vmatprep.subr.bf16.mxu1 %v2122_v25  ;;  %v1784_v10 = vcombine.low %v70_v9, %v70_v9  ;;  %v1785_v11 = vcombine.high %v70_v9, %v70_v9  ;;  %v2172_v16 = vld [vmem:[%s2539_s3 + $0x18] sm:$0xff]   ;;  %v2175_v19 = vld [vmem:[%s2539_s3 + $0x30] sm:$0xff]   ;;  %905 = vrot.lane.b32.xlu0 %v901_v21, %s2298_s22  ;;  %v902_v22 = vld [vmem:[%s2545_s9 + $0x8] sm:$0xff] }
  0x40   :  { %v2176_v20 = vld [vmem:[%s2539_s3 + $0x38] sm:$0xff]   ;;  %v1777_v25 = vld [vmem:[%s2538_s2] ss:$0 sm:$0xff]  ;;  %v1006_v9 = vld [vmem:[#allocation4 + $0x48] sm:$0xff] }
  0x41   :  { %1972 = vmatpush3.bf16.msra.mxu0 %v2123_v26  ;;  %v1026_v21 = vld [vmem:[#allocation4 + $0xe8] sm:$0xff] }
  0x42   :  { %1994 = vmatpush3.bf16.msra.mxu1 %v2124_v27  ;;  %1973 = vmatprep.subr.bf16.mxu0 %v2125_v28 }
  0x43   :  { %1995 = vmatprep.subr.bf16.mxu1 %v2126_v29  ;;  %907 = vrot.lane.b32.xlu0 %v902_v22, %s2298_s22 }
  0x45   :  { %1974 = vmatpush3.bf16.msra.mxu0 %v2127_v30 }
  0x46   :  { %1996 = vmatpush3.bf16.msra.mxu1 %v2128_v31  ;;  %2003 = vmatprep.subr.bf16.mxu0 %v2133_v38 }
  0x47   :  { %2025 = vmatprep.subr.bf16.mxu1 %v2134_v39 }
  0x48   :  { %651 = vmatmul.mubr.bf16.vlgmr.msra.gmra.mrb[0].mxu0 %v1778_v34 }
  0x49   :  { %691 = vmatmul.mubr.bf16.vlgmr.msra.gmra.mrb[0].mxu1 %v1780_v36  ;;  %2004 = vmatpush3.bf16.msra.mxu0 %v2135_v40 }
  0x4a   :  { %2026 = vmatpush3.bf16.msra.mxu1 %v2136_v41  ;;  %2005 = vmatprep.subr.bf16.mxu0 %v2137_v42 }
  0x4b   :  { %2027 = vmatprep.subr.bf16.mxu1 %v2138_v43  ;;  %730 = vmatprep.mubr.bf16.mxu0 %v1783_v8 }
  0x4c   :  { %770 = vmatprep.mubr.bf16.mxu1 %v1785_v11 }
  0x4d   :  { %2006 = vmatpush3.bf16.msra.mxu0 %v2139_v44 }
  0x4e   :  { %2028 = vmatpush3.bf16.msra.mxu1 %v2140_v45  ;;  %2007 = vmatprep.subr.bf16.mxu0 %v2141_v46 }
  0x4f   :  { %2029 = vmatprep.subr.bf16.mxu1 %v2142_v47 }
  0x51   :  { %2008 = vmatpush3.bf16.msra.mxu0 %v2143_v48 }
  0x52   :  { %2030 = vmatpush3.bf16.msra.mxu1 %v2144_v49  ;;  %2009 = vmatprep.subr.bf16.mxu0 %v2145_v50  ;;  %v1850_v50 = vld [vmem:[%s2540_s4] ss:$0 sm:$0xff] }
  0x53   :  { %2031 = vmatprep.subr.bf16.mxu1 %v2146_v51 }
  0x55   :  { %2010 = vmatpush3.bf16.msra.mxu0 %v2147_v52 }
  0x56   :  { %2032 = vmatpush3.bf16.msra.mxu1 %v2148_v53  ;;  %2011 = vmatprep.subr.bf16.mxu0 %v2149_v54 }
  0x57   :  { %2033 = vmatprep.subr.bf16.mxu1 %v2150_v55 }
  0x59   :  { %2012 = vmatpush3.bf16.msra.mxu0 %v2151_v56 }
  0x5a   :  { %2034 = vmatpush3.bf16.msra.mxu1 %v2152_v57  ;;  %2013 = vmatprep.subr.bf16.mxu0 %v2153_v58  ;;  %v891_v57 = vlaneseq }
  0x5b   :  { %2035 = vmatprep.subr.bf16.mxu1 %v2154_v59  ;;  %v2177_v59 = vld [vmem:[%s2541_s5] sm:$0xff]  }
  0x5d   :  { %2014 = vmatpush3.bf16.msra.mxu0 %v2155_v60  ;;  %v892_v60 = vand.u32 127, %v891_v57 }
  0x5e   :  { %2036 = vmatpush3.bf16.msra.mxu1 %v2156_v61  ;;  %2015 = vmatprep.subr.bf16.mxu0 %v2157_v62  ;;  %v2178_v61 = vld [vmem:[%s2541_s5 + $0x8] sm:$0xff]  }
  0x5f   :  { %2037 = vmatprep.subr.bf16.mxu1 %v2158_v63  ;;  %vm893_vm1 = vcmp.ge.s32.totalorder %v892_v60, 32  ;;  %vm894_vm2 = vcmp.lt.s32.totalorder %v892_v60, 64  ;;  %v2462_v63 = vld [vmem:[#allocation4] sm:$0xff]  ;;  %v1046_v60 = vld [vmem:[#allocation4 + $0x188] sm:$0xff] }
  0x60   :  { %vm895_vm3 = vmand %vm893_vm1, %vm894_vm2 }
  0x61   :  { %2016 = vmatpush3.bf16.msra.mxu0 %v2159_v0  ;;  %v2464_v0 = vld [vmem:[#allocation4 + $0x20] sm:$0xff] }
  0x62   :  { %2038 = vmatpush3.bf16.msra.mxu1 %v2160_v1  ;;  %2017 = vmatprep.subr.bf16.mxu0 %v2161_v2  ;;  %v998_v1 = vld [vmem:[#allocation4 + $0x8] sm:$0xff] }
  0x63   :  { %2039 = vmatprep.subr.bf16.mxu1 %v2162_v3  ;;  %v1863_v3 = vcombine.low %v2462_v63, %v2464_v0 }
  0x65   :  { %2018 = vmatpush3.bf16.msra.mxu0 %v2163_v4  ;;  %v1864_v4 = vcombine.high %v2462_v63, %v2464_v0 }
  0x66   :  { %2040 = vmatpush3.bf16.msra.mxu1 %v2164_v5  ;;  %2059 = vmatprep.subr.bf16.mxu0 %v2299_v13  ;;  %v1002_v5 = vld [vmem:[#allocation4 + $0x28] sm:$0xff] }
  0x67   :  { %2079 = vmatprep.subr.bf16.mxu1 %v2299_v13  ;;  %v1866_v8 = vcombine.high %v998_v1, %v1002_v5 }
  0x68   :  { %731 = vmatmul.mubr.bf16.vlgmr.msra.gmra.mrb[4].mxu0 %v1782_v7  ;;  %v1865_v7 = vcombine.low %v998_v1, %v1002_v5 }
  0x69   :  { %771 = vmatmul.mubr.bf16.vlgmr.msra.gmra.mrb[4].mxu1 %v1784_v10  ;;  %2060 = vmatpush3.bf16.msra.mxu0 %v2169_v12  ;;  %v1010_v10 = vld [vmem:[#allocation4 + $0x68] sm:$0xff] }
  0x6a   :  { %2061 = vmatprep.subr.bf16.mxu0 %v2299_v13  ;;  %2075 = vmatprep.mubr.msk.bf16.mxu0 %vm2300_vm0, %v2299_v13 }
  0x6b   :  { %2083 = vmatprep.mubr.msk.bf16.mxu1 %vm2300_vm0, %v2299_v13  ;;  %2080 = vmatpush3.bf16.msra.mxu1 %v2177_v59  ;;  %v1049_v59 = vld [vmem:[#allocation4 + $0x1a0] sm:$0xff] }
  0x6c   :  { %2081 = vmatprep.subr.bf16.mxu1 %v2299_v13 }
  0x6d   :  { %2062 = vmatpush3.bf16.msra.mxu0 %v2170_v14  ;;  %v1873_v14 = vcombine.low %v1006_v9, %v1010_v10 }
  0x6e   :  { %2063 = vmatprep.subr.bf16.mxu0 %v2299_v13 }
  0x6f   :  { %2082 = vmatpush3.bf16.msra.mxu1 %v2178_v61 }
  0x70   :  { %1423 = vmatprep.subr.bf16.mxu1 %v1864_v4  ;;  %v1054_v4 = vld [vmem:[#allocation4 + $0x1c8] sm:$0xff] }
  0x71   :  { %2064 = vmatpush3.bf16.msra.mxu0 %v2171_v15  ;;  %v1014_v15 = vld [vmem:[#allocation4 + $0x88] sm:$0xff] }
  0x72   :  { %2065 = vmatprep.subr.bf16.mxu0 %v2299_v13 }
  0x75   :  { %2066 = vmatpush3.bf16.msra.mxu0 %v2172_v16  ;;  %v1018_v16 = vld [vmem:[#allocation4 + $0xa8] sm:$0xff] }
  0x76   :  { %2067 = vmatprep.subr.bf16.mxu0 %v2299_v13 }
  0x79   :  { %2068 = vmatpush3.bf16.msra.mxu0 %v2173_v17 }
  0x7a   :  { %2069 = vmatprep.subr.bf16.mxu0 %v2299_v13 }
  0x7d   :  { %2070 = vmatpush3.bf16.msra.mxu0 %v2174_v18  ;;  %v1882_v18 = vcombine.high %v1014_v15, %v1018_v16 }
  0x7e   :  { %2071 = vmatprep.subr.bf16.mxu0 %v2299_v13 }
  0x81   :  { %2072 = vmatpush3.bf16.msra.mxu0 %v2175_v19  ;;  %v1881_v19 = vcombine.low %v1014_v15, %v1018_v16 }
  0x82   :  { %2073 = vmatprep.subr.bf16.mxu0 %v2299_v13  ;;  %v1874_v13 = vcombine.high %v1006_v9, %v1010_v10  ;;  %v999_v10 = vld [vmem:[#allocation4 + $0x10] sm:$0xff] }
  0x85   :  { %2074 = vmatpush3.bf16.msra.mxu0 %v2176_v20  ;;  %v1022_v20 = vld [vmem:[#allocation4 + $0xc8] sm:$0xff] }
  0x86   :  { %1466 = vmatprep.subr.bf16.mxu0 %v1866_v8  ;;  %v1890_v22 = vcombine.high %v1022_v20, %v1026_v21 }
  0xb1   :  { %v906_v62 = vpop.permute.xlu0 %905 }
  0xb5   :  { %v908_v12 = vpop.permute.xlu0 %907 }
 0x11b   :  { %v1975_v23 = vpop.f32.mrb[0].mxu0 }
 0x11c   :  { %v1997_v24 = vpop.f32.mrb[0].mxu1  ;;  %v1976_v26 = vpop.f32.mrb[1].mxu0 }
 0x11d   :  { %v1998_v27 = vpop.f32.mrb[1].mxu1  ;;  %v1977_v28 = vadd.f32 %v1976_v26, %v1975_v23  ;;  %v1978_v30 = vpop.f32.mrb[2].mxu0  ;;  %v1889_v23 = vcombine.low %v1022_v20, %v1026_v21 }
 0x11e   :  { %v1999_v29 = vadd.f32 %v1998_v27, %v1997_v24  ;;  %v2000_v31 = vpop.f32.mrb[2].mxu1  ;;  %v1979_v32 = vpop.f32.mrb[3].mxu0  ;;  %v1030_v24 = vld [vmem:[#allocation4 + $0x108] sm:$0xff] }
 0x11f   :  { %v2001_v33 = vpop.f32.mrb[3].mxu1  ;;  %v653_v34 = vadd.f32 %v1977_v28, %v1777_v25  ;;  %v1034_v25 = vld [vmem:[#allocation4 + $0x128] sm:$0xff] }
 0x120   :  { %v1898_v26 = vcombine.high %v1030_v24, %v1034_v25  ;;  %v1897_v27 = vcombine.low %v1030_v24, %v1034_v25  ;;  %v1038_v28 = vld [vmem:[#allocation4 + $0x148] sm:$0xff] }
 0x121   :  { %v693_v35 = vadd.f32 %v1999_v29, %v653_v34  ;;  %v1042_v29 = vld [vmem:[#allocation4 + $0x168] sm:$0xff] }
 0x122   :  { %v1906_v30 = vcombine.high %v1038_v28, %v1042_v29  ;;  %v1905_v31 = vcombine.low %v1038_v28, %v1042_v29  ;;  %v1008_v28 = vld [vmem:[#allocation4 + $0x58] sm:$0xff] }
 0x123   :  { %v1012_v29 = vld [vmem:[#allocation4 + $0x78] sm:$0xff] }
 0x13b   :  { %v2019_v36 = vpop.f32.mrb[4].mxu0 }
 0x13c   :  { %v2041_v37 = vpop.f32.mrb[4].mxu1  ;;  %v2020_v38 = vpop.f32.mrb[5].mxu0 }
 0x13d   :  { %v2042_v39 = vpop.f32.mrb[5].mxu1  ;;  %v2021_v40 = vadd.f32 %v2020_v38, %v2019_v36  ;;  %v2022_v42 = vpop.f32.mrb[6].mxu0  ;;  %v1009_v36 = vld [vmem:[#allocation4 + $0x60] sm:$0xff] }
 0x13e   :  { %v2043_v41 = vadd.f32 %v2042_v39, %v2041_v37  ;;  %v2044_v43 = vpop.f32.mrb[6].mxu1  ;;  %v2023_v44 = vpop.f32.mrb[7].mxu0 }
 0x13f   :  { %v2045_v45 = vpop.f32.mrb[7].mxu1  ;;  %v733_v46 = vadd.f32 %v2021_v40, %v693_v35  ;;  %v1005_v35 = vld [vmem:[#allocation4 + $0x40] sm:$0xff] }
 0x140   :  { %v1872_v39 = vcombine.high %v1005_v35, %v1009_v36  ;;  %v1013_v40 = vld [vmem:[#allocation4 + $0x80] sm:$0xff]  ;;  %v1871_v42 = vcombine.low %v1005_v35, %v1009_v36  ;;  %v1015_v35 = vld [vmem:[#allocation4 + $0x90] sm:$0xff] }
 0x141   :  { %v773_v47 = vadd.f32 %v2043_v41, %v733_v46  ;;  %v1017_v41 = vld [vmem:[#allocation4 + $0xa0] sm:$0xff]  ;;  %v1019_v36 = vld [vmem:[#allocation4 + $0xb0] sm:$0xff] }
 0x142   :  { %v1880_v43 = vcombine.high %v1013_v40, %v1017_v41  ;;  %v1021_v44 = vld [vmem:[#allocation4 + $0xc0] sm:$0xff]  ;;  %v1879_v46 = vcombine.low %v1013_v40, %v1017_v41  ;;  %v1877_v40 = vcombine.low %v1008_v28, %v1012_v29  ;;  %v1884_v41 = vcombine.high %v1015_v35, %v1019_v36 }
 0x143   :  { %v778_v48 = vmax.f32 %v773_v47, 0.0  ;;  %v1025_v45 = vld [vmem:[#allocation4 + $0xe0] sm:$0xff] }
 0x144   :  { %v1888_v47 = vcombine.high %v1021_v44, %v1025_v45 }
 0x145   :  { %v779_v49 = vpack.c.bf16 %v778_v48, %v778_v48  ;;  %v1029_v48 = vld [vmem:[#allocation4 + $0x100] sm:$0xff] }
 0x147   :  { %2076 = vmatmul.mubr.bf16.vlgmr.msra.gmra.mrb[8].mxu0 %v779_v49  ;;  %v1033_v49 = vld [vmem:[#allocation4 + $0x120] sm:$0xff] }
 0x148   :  { %1467 = vmatpush1.bf16.msra.mxu0 %v1865_v7 }
 0x149   :  { %1468 = vmatprep.subr.bf16.mxu0 %v1874_v13 }
 0x14c   :  { %1469 = vmatpush1.bf16.msra.mxu0 %v1873_v14  ;;  %v1004_v14 = vld [vmem:[#allocation4 + $0x38] sm:$0xff] }
 0x14d   :  { %1470 = vmatprep.subr.bf16.mxu0 %v1882_v18  ;;  %v2302_v18 = vmov 0  }
 0x14e   :  { %1498 = vmatprep.mubr.bf16.mxu0 %v2302_v18 }
 0x150   :  { %1471 = vmatpush1.bf16.msra.mxu0 %v1881_v19  ;;  %v1859_v19 = vld [vmem:[%s2542_s6] ss:$0 sm:$0xff] }
 0x151   :  { %1472 = vmatprep.subr.bf16.mxu0 %v1890_v22 }
 0x154   :  { %1473 = vmatpush1.bf16.msra.mxu0 %v1889_v23 }
 0x155   :  { %1474 = vmatprep.subr.bf16.mxu0 %v1898_v26  ;;  %v1007_v26 = vld [vmem:[#allocation4 + $0x50] sm:$0xff] }
 0x158   :  { %1475 = vmatpush1.bf16.msra.mxu0 %v1897_v27  ;;  %v1011_v27 = vld [vmem:[#allocation4 + $0x70] sm:$0xff] }
 0x159   :  { %1476 = vmatprep.subr.bf16.mxu0 %v1906_v30 }
 0x15c   :  { %1477 = vmatpush1.bf16.msra.mxu0 %v1905_v31 }
 0x21a   :  { %v885_v51 = vpop.f32.mrb[8].mxu0 }
 0x21b   :  { %v886_v52 = vadd.f32 %v1850_v50, %v885_v51  ;;  %v2077_v53 = vpop.f32.mrb[9].mxu0  ;;  %v1887_v50 = vcombine.low %v1021_v44, %v1025_v45  ;;  %v1896_v51 = vcombine.high %v1029_v48, %v1033_v49  ;;  %v1027_v44 = vld [vmem:[#allocation4 + $0xf0] sm:$0xff]  ;;  %v1024_v45 = vld [vmem:[#allocation4 + $0xd8] sm:$0xff] }
 0x21c   :  { %v888_v54 = vpop.f32.mrb[10].mxu0  ;;  %v1041_v53 = vld [vmem:[#allocation4 + $0x160] sm:$0xff] }
 0x21d   :  { %v896_v55 = vmul.f32 0.5, %v886_v52  ;;  %v2078_v56 = vpop.f32.mrb[11].mxu0  ;;  %v1895_v54 = vcombine.low %v1029_v48, %v1033_v49 }
 0x21f   :  { %v897_v58 = vmul.f32 1.442695, %v896_v55 }
 0x221   :  { %2179 = vpow2.f32 %v897_v58  ;;  %v1045_v58 = vld [vmem:[#allocation4 + $0x180] sm:$0xff] }
 0x222   :  { %v1912_v61 = vcombine.high %v1045_v58, %v1049_v59  ;;  %v1911_v63 = vcombine.low %v1045_v58, %v1049_v59 }
 0x22b   :  { %v2180_v2 = vpop.eup %2179 }
 0x22c   :  { %v899_v6 = vsel %vm895_vm3, %v2180_v2, %v886_v52  ;;  %v1037_v52 = vld [vmem:[#allocation4 + $0x140] sm:$0xff] }
 0x22d   :  { %900 = vst [vmem:[%s2546_s10] sm:$0xff] %v899_v6  ;;  %v911_v11 = vmul.f32 %v906_v62, %v899_v6  ;;  %v912_v17 = vmul.f32 %v908_v12, %v899_v6  ;;  %v1904_v55 = vcombine.high %v1037_v52, %v1041_v53  ;;  %v1903_v56 = vcombine.low %v1037_v52, %v1041_v53  ;;  %v1050_v62 = vld [vmem:[#allocation4 + $0x1a8] sm:$0xff]  ;;  %v1053_v2 = vld [vmem:[#allocation4 + $0x1c0] sm:$0xff]  ;;  %v1000_v12 = vld [vmem:[#allocation4 + $0x18] sm:$0xff] }
 0x22e   :  { %v1913_v0 = vcombine.low %v1046_v60, %v1050_v62  ;;  %v1914_v1 = vcombine.high %v1046_v60, %v1050_v62  ;;  %v1869_v16 = vcombine.low %v1000_v12, %v1004_v14  ;;  %v1035_v52 = vld [vmem:[#allocation4 + $0x130] sm:$0xff]  ;;  %v1032_v53 = vld [vmem:[#allocation4 + $0x118] sm:$0xff] }
 0x22f   :  { %915 = vrot.lane.b32.xlu1 %v911_v11, %s2301_s23  ;;  %v1003_v11 = vld [vmem:[#allocation4 + $0x30] sm:$0xff]  ;;  %v1040_v62 = vld [vmem:[#allocation4 + $0x158] sm:$0xff] }
 0x230   :  { %1478 = vmatprep.subr.bf16.mxu0 %v1914_v1  ;;  %v1868_v13 = vcombine.high %v999_v10, %v1003_v11  ;;  %v1867_v15 = vcombine.low %v999_v10, %v1003_v11  ;;  %v1039_v60 = vld [vmem:[#allocation4 + $0x150] sm:$0xff] }
 0x231   :  { %1479 = vmatpush1.bf16.msra.mxu0 %v1913_v0 }
 0x233   :  { %917 = vrot.lane.b32.xlu1 %v912_v17, %s2301_s23  ;;  %v1870_v17 = vcombine.high %v1000_v12, %v1004_v14  ;;  %v1055_v12 = vld [vmem:[#allocation4 + $0x1d0] sm:$0xff]  ;;  %v1056_v14 = vld [vmem:[#allocation4 + $0x1d8] sm:$0xff] }
 0x2a1   :  { %v916_v32 = vpop.permute.xlu1 %915 }
 0x2a2   :  { %v921_v33 = vadd.f32 %v916_v32, %v899_v6 }
 0x2a4   :  { %924 = vst.msk [vmem:[%s2547_s11] sm:$0xff] %vm923_vm4, %v921_v33 }
 0x2a5   :  { %v918_v34 = vpop.permute.xlu1 %917 }
 0x2a6   :  { %v922_v37 = vadd.f32 %v918_v34, %v899_v6  ;;  %v1058_v6 = vld [vmem:[#allocation4 + $0x1e8] sm:$0xff]  ;;  %v1878_v34 = vcombine.high %v1008_v28, %v1012_v29 }
 0x2a7   :  { %v1921_v8 = vcombine.low %v1054_v4, %v1058_v6  ;;  %v1922_v9 = vcombine.high %v1054_v4, %v1058_v6  ;;  %v1047_v4 = vld [vmem:[#allocation4 + $0x190] sm:$0xff]  ;;  %v1048_v6 = vld [vmem:[#allocation4 + $0x198] sm:$0xff] }
 0x2a8   :  { %925 = vst.msk [vmem:[%s2547_s11 + $0x8] sm:$0xff] %vm923_vm4, %v922_v37  ;;  %v926_v38 = vpack.c.bf16 %v922_v37, %v921_v33  ;;  %v1876_v33 = vcombine.high %v1007_v26, %v1011_v27  ;;  %v1016_v37 = vld [vmem:[#allocation4 + $0x98] sm:$0xff] }
 0x2a9   :  { %1480 = vmatprep.subr.bf16.mxu0 %v1922_v9 }
 0x2aa   :  { %2084 = vmatmul.mubr.msk.bf16.vlgmr.msra.gmra.mrb[8].mxu1 %vm923_vm4, %v926_v38  ;;  %1481 = vmatpush1.bf16.msra.mxu0 %v1921_v8  ;;  %v1020_v38 = vld [vmem:[#allocation4 + $0xb8] sm:$0xff] }
 0x2ab   :  { %1424 = vmatpush1.bf16.msra.mxu1 %v1863_v3  ;;  %v1057_v3 = vld [vmem:[#allocation4 + $0x1e0] sm:$0xff]  ;;  %1455 = vmatprep.mubr.bf16.mxu1 %v2302_v18  ;;  %v1885_v48 = vcombine.low %v1016_v37, %v1020_v38 }
 0x2ac   :  { %1425 = vmatprep.subr.bf16.mxu1 %v1872_v39  ;;  %v1920_v5 = vcombine.high %v1053_v2, %v1057_v3  ;;  %v1919_v7 = vcombine.low %v1053_v2, %v1057_v3  ;;  %1552 = vmatprep.subr.bf16.mxu0 %v1870_v17  ;;  %v1875_v39 = vcombine.low %v1007_v26, %v1011_v27 }
 0x2af   :  { %1426 = vmatpush1.bf16.msra.mxu1 %v1871_v42  ;;  %v1886_v42 = vcombine.high %v1016_v37, %v1020_v38 }
 0x2b0   :  { %1427 = vmatprep.subr.bf16.mxu1 %v1880_v43  ;;  %v1023_v43 = vld [vmem:[#allocation4 + $0xd0] sm:$0xff] }
 0x2b1   :  { %v1892_v49 = vcombine.high %v1023_v43, %v1027_v44 }
 0x2b3   :  { %1428 = vmatpush1.bf16.msra.mxu1 %v1879_v46  ;;  %v1028_v46 = vld [vmem:[#allocation4 + $0xf8] sm:$0xff] }
 0x2b4   :  { %1429 = vmatprep.subr.bf16.mxu1 %v1888_v47  ;;  %v1883_v47 = vcombine.low %v1015_v35, %v1019_v36 }
 0x2b7   :  { %1430 = vmatpush1.bf16.msra.mxu1 %v1887_v50  ;;  %v1894_v50 = vcombine.high %v1024_v45, %v1028_v46 }
 0x2b8   :  { %1431 = vmatprep.subr.bf16.mxu1 %v1896_v51  ;;  %v1031_v51 = vld [vmem:[#allocation4 + $0x110] sm:$0xff] }
 0x2b9   :  { %v1900_v58 = vcombine.high %v1031_v51, %v1035_v52  ;;  %v1899_v0 = vcombine.low %v1031_v51, %v1035_v52 }
 0x2bb   :  { %1432 = vmatpush1.bf16.msra.mxu1 %v1895_v54  ;;  %v1036_v54 = vld [vmem:[#allocation4 + $0x138] sm:$0xff] }
 0x2bc   :  { %1433 = vmatprep.subr.bf16.mxu1 %v1904_v55  ;;  %v1891_v55 = vcombine.low %v1023_v43, %v1027_v44  ;;  %v1902_v59 = vcombine.high %v1032_v53, %v1036_v54  ;;  %v1901_v1 = vcombine.low %v1032_v53, %v1036_v54 }
 0x2bf   :  { %1434 = vmatpush1.bf16.msra.mxu1 %v1903_v56  ;;  %v1893_v56 = vcombine.low %v1024_v45, %v1028_v46 }
 0x2c0   :  { %1435 = vmatprep.subr.bf16.mxu1 %v1912_v61  ;;  %v1043_v61 = vld [vmem:[#allocation4 + $0x170] sm:$0xff] }
 0x2c1   :  { %v1908_v2 = vcombine.high %v1039_v60, %v1043_v61  ;;  %v1907_v8 = vcombine.low %v1039_v60, %v1043_v61 }
 0x2c3   :  { %1436 = vmatpush1.bf16.msra.mxu1 %v1911_v63  ;;  %v1044_v63 = vld [vmem:[#allocation4 + $0x178] sm:$0xff] }
 0x2c4   :  { %1437 = vmatprep.subr.bf16.mxu1 %v1920_v5  ;;  %v1910_v3 = vcombine.high %v1040_v62, %v1044_v63  ;;  %v1051_v5 = vld [vmem:[#allocation4 + $0x1b0] sm:$0xff]  ;;  %v1909_v9 = vcombine.low %v1040_v62, %v1044_v63 }
 0x2c5   :  { %v1916_v10 = vcombine.high %v1047_v4, %v1051_v5 }
 0x2c7   :  { %1438 = vmatpush1.bf16.msra.mxu1 %v1919_v7  ;;  %v1052_v7 = vld [vmem:[#allocation4 + $0x1b8] sm:$0xff] }
 0x2c8   :  { %1509 = vmatprep.subr.bf16.mxu1 %v1868_v13  ;;  %v1918_v11 = vcombine.high %v1048_v6, %v1052_v7  ;;  %v1059_v13 = vld [vmem:[#allocation4 + $0x1f0] sm:$0xff]  ;;  %v1917_v17 = vcombine.low %v1048_v6, %v1052_v7 }
 0x37d   :  { %v987_v20 = vpop.f32.mrb[8].mxu1 }
 0x37e   :  { %v988_v21 = vadd.f32 %v1859_v19, %v987_v20  ;;  %v2085_v22 = vpop.f32.mrb[9].mxu1  ;;  %v1923_v20 = vcombine.low %v1055_v12, %v1059_v13 }
 0x37f   :  { %v990_v23 = vpop.f32.mrb[10].mxu1  ;;  %v2489_v22 = vshrl.u32 %v891_v57, 7 }
 0x380   :  { %v991_v24 = vadd.f32 %v1859_v19, %v990_v23  ;;  %v2086_v25 = vpop.f32.mrb[11].mxu1  ;;  %v994_v30 = vmax.f32 %v988_v21, 0.0 }
 0x381   :  { %v1065_v23 = vsub.s32 0, %v2489_v22  ;;  %v2496_v25 = vld [vmem:[%s2544_s8] sm:$0xff]  ;;  %v1069_v26 = vsub.s32 1, %v2489_v22  ;;  %v1077_v27 = vsub.s32 3, %v2489_v22 }
 0x382   :  { %v995_v31 = vmax.f32 %v991_v24, 0.0  ;;  %v1073_v24 = vsub.s32 2, %v2489_v22 }
 0x383   :  { %v1066_v28 = vrot.slane %v2496_v25, %v1065_v23  ;;  %v1070_v57 = vrot.slane %v2496_v25, %v1069_v26 }
 0x384   :  { %v2482_v32 = vpack.c.bf16 %v995_v31, %v994_v30  ;;  %v1074_v29 = vrot.slane %v2496_v25, %v1073_v24  ;;  %v1078_v30 = vrot.slane %v2496_v25, %v1077_v27 }
 0x386   :  { %1456 = vmatmul.mubr.bf16.vlgmr.msra.gmra.mrb[12].mxu1 %v2482_v32  ;;  %1499 = vmatmul.mubr.bf16.vlgmr.msra.gmra.mrb[12].mxu0 %v2482_v32 }
 0x387   :  { %1510 = vmatpush1.bf16.msra.mxu1 %v1867_v15  ;;  %1553 = vmatpush1.bf16.msra.mxu0 %v1869_v16  ;;  %v1060_v15 = vld [vmem:[#allocation4 + $0x1f8] sm:$0xff]  ;;  %v1915_v16 = vcombine.low %v1047_v4, %v1051_v5 }
 0x388   :  { %1511 = vmatprep.subr.bf16.mxu1 %v1876_v33  ;;  %1554 = vmatprep.subr.bf16.mxu0 %v1878_v34  ;;  %v1926_v19 = vcombine.high %v1056_v14, %v1060_v15  ;;  %v1925_v21 = vcombine.low %v1056_v14, %v1060_v15 }
 0x389   :  { %1541 = vmatprep.mubr.bf16.mxu1 %v2302_v18  ;;  %1584 = vmatprep.mubr.bf16.mxu0 %v2302_v18  ;;  %v1924_v18 = vcombine.high %v1055_v12, %v1059_v13 }
 0x38b   :  { %1512 = vmatpush1.bf16.msra.mxu1 %v1875_v39  ;;  %1555 = vmatpush1.bf16.msra.mxu0 %v1877_v40 }
 0x38c   :  { %1513 = vmatprep.subr.bf16.mxu1 %v1884_v41  ;;  %1556 = vmatprep.subr.bf16.mxu0 %v1886_v42 }
 0x38f   :  { %1514 = vmatpush1.bf16.msra.mxu1 %v1883_v47  ;;  %1557 = vmatpush1.bf16.msra.mxu0 %v1885_v48 }
 0x390   :  { %1515 = vmatprep.subr.bf16.mxu1 %v1892_v49  ;;  %1558 = vmatprep.subr.bf16.mxu0 %v1894_v50 }
 0x393   :  { %1516 = vmatpush1.bf16.msra.mxu1 %v1891_v55  ;;  %1559 = vmatpush1.bf16.msra.mxu0 %v1893_v56 }
 0x394   :  { %1517 = vmatprep.subr.bf16.mxu1 %v1900_v58  ;;  %1560 = vmatprep.subr.bf16.mxu0 %v1902_v59 }
 0x397   :  { %1518 = vmatpush1.bf16.msra.mxu1 %v1899_v0  ;;  %1561 = vmatpush1.bf16.msra.mxu0 %v1901_v1 }
 0x398   :  { %1519 = vmatprep.subr.bf16.mxu1 %v1908_v2  ;;  %1562 = vmatprep.subr.bf16.mxu0 %v1910_v3 }
 0x39b   :  { %1520 = vmatpush1.bf16.msra.mxu1 %v1907_v8  ;;  %1563 = vmatpush1.bf16.msra.mxu0 %v1909_v9  ;;  %v1081_v8 = vsub.s32 4, %v2489_v22  ;;  %v1089_v9 = vsub.s32 6, %v2489_v22 }
 0x39c   :  { %1521 = vmatprep.subr.bf16.mxu1 %v1916_v10  ;;  %1564 = vmatprep.subr.bf16.mxu0 %v1918_v11  ;;  %v1085_v10 = vsub.s32 5, %v2489_v22  ;;  %v1093_v11 = vsub.s32 7, %v2489_v22 }
 0x39d   :  { %v1082_v14 = vrot.slane %v2496_v25, %v1081_v8  ;;  %v1090_v15 = vrot.slane %v2496_v25, %v1089_v9 }
 0x39f   :  { %1522 = vmatpush1.bf16.msra.mxu1 %v1915_v16  ;;  %1565 = vmatpush1.bf16.msra.mxu0 %v1917_v17  ;;  %v1086_v17 = vrot.slane %v2496_v25, %v1085_v10 }
 0x3a0   :  { %1523 = vmatprep.subr.bf16.mxu1 %v1924_v18  ;;  %1566 = vmatprep.subr.bf16.mxu0 %v1926_v19  ;;  %v1094_v18 = vrot.slane %v2496_v25, %v1093_v11 }
 0x3a3   :  { %1524 = vmatpush1.bf16.msra.mxu1 %v1923_v20  ;;  %1567 = vmatpush1.bf16.msra.mxu0 %v1925_v21 }
 0x3a6   :  { %1542 = vmatmul.mubr.bf16.vlgmr.msra.gmra.mrb[16].mxu1 %v2482_v32  ;;  %1585 = vmatmul.mubr.bf16.vlgmr.msra.gmra.mrb[16].mxu0 %v2482_v32 }
 0x459   :  { %v1457_v31 = vpop.f32.mrb[12].mxu1  ;;  %v1500_v32 = vpop.f32.mrb[12].mxu0 }
 0x45a   :  { %v1458_v33 = vadd.f32 %v1457_v31, %v1066_v28  ;;  %v1501_v34 = vadd.f32 %v1500_v32, %v1074_v29  ;;  %v1459_v35 = vpop.f32.mrb[13].mxu1  ;;  %v1502_v36 = vpop.f32.mrb[13].mxu0 }
 0x45b   :  { %v1460_v37 = vadd.f32 %v1459_v35, %v1070_v57  ;;  %v1503_v38 = vadd.f32 %v1502_v36, %v1078_v30  ;;  %v1461_v39 = vpop.f32.mrb[14].mxu1  ;;  %v1504_v40 = vpop.f32.mrb[14].mxu0 }
 0x45c   :  { %v1927_v41 = vmul.f32 -1.442695, %v1458_v33  ;;  %v1929_v42 = vmul.f32 -1.442695, %v1501_v34  ;;  %v1462_v43 = vadd.f32 %v1461_v39, %v1066_v28  ;;  %v1505_v44 = vadd.f32 %v1504_v40, %v1074_v29  ;;  %v1463_v45 = vpop.f32.mrb[15].mxu1  ;;  %v1506_v46 = vpop.f32.mrb[15].mxu0 }
 0x45d   :  { %v1928_v47 = vmul.f32 -1.442695, %v1460_v37  ;;  %v1930_v48 = vmul.f32 -1.442695, %v1503_v38  ;;  %v1464_v49 = vadd.f32 %v1463_v45, %v1070_v57  ;;  %v1507_v50 = vadd.f32 %v1506_v46, %v1078_v30 }
 0x45e   :  { %2181 = vpow2.f32 %v1927_v41  ;;  %v1935_v51 = vmul.f32 -1.442695, %v1462_v43  ;;  %v1937_v52 = vmul.f32 -1.442695, %v1505_v44 }
 0x45f   :  { %2183 = vpow2.f32 %v1929_v42  ;;  %v1936_v53 = vmul.f32 -1.442695, %v1464_v49  ;;  %v1938_v54 = vmul.f32 -1.442695, %v1507_v50 }
 0x460   :  { %2185 = vpow2.f32 %v1928_v47 }
 0x461   :  { %2187 = vpow2.f32 %v1930_v48 }
 0x462   :  { %2189 = vpow2.f32 %v1935_v51 }
 0x463   :  { %2191 = vpow2.f32 %v1937_v52 }
 0x464   :  { %2193 = vpow2.f32 %v1936_v53 }
 0x465   :  { %2195 = vpow2.f32 %v1938_v54 }
 0x468   :  { %v2182_v55 = vpop.eup %2181 }
 0x469   :  { %v2184_v56 = vpop.eup %2183  ;;  %v1643_v58 = vadd.f32 1.0, %v2182_v55 }
 0x46a   :  { %v2186_v59 = vpop.eup %2185  ;;  %v1645_v60 = vadd.f32 1.0, %v2184_v56 }
 0x46b   :  { %v2188_v61 = vpop.eup %2187  ;;  %2197 = vrcp.f32 %v1643_v58  ;;  %v1644_v62 = vadd.f32 1.0, %v2186_v59 }
 0x46c   :  { %v2190_v63 = vpop.eup %2189  ;;  %2199 = vrcp.f32 %v1645_v60  ;;  %v1646_v0 = vadd.f32 1.0, %v2188_v61 }
 0x46d   :  { %v2192_v1 = vpop.eup %2191  ;;  %2201 = vrcp.f32 %v1644_v62  ;;  %v1651_v2 = vadd.f32 1.0, %v2190_v63 }
 0x46e   :  { %v2194_v3 = vpop.eup %2193  ;;  %2203 = vrcp.f32 %v1646_v0  ;;  %v1653_v4 = vadd.f32 1.0, %v2192_v1 }
 0x46f   :  { %v2196_v5 = vpop.eup %2195  ;;  %2205 = vrcp.f32 %v1651_v2  ;;  %v1652_v6 = vadd.f32 1.0, %v2194_v3 }
 0x470   :  { %2207 = vrcp.f32 %v1653_v4  ;;  %v1654_v7 = vadd.f32 1.0, %v2196_v5 }
 0x471   :  { %2209 = vrcp.f32 %v1652_v6 }
 0x472   :  { %2211 = vrcp.f32 %v1654_v7 }
 0x475   :  { %v2198_v12 = vpop.eup %2197 }
 0x476   :  { %v2200_v13 = vpop.eup %2199 }
 0x477   :  { %v2202_v16 = vpop.eup %2201 }
 0x478   :  { %v2204_v19 = vpop.eup %2203  ;;  %v1951_v20 = vpack.c.bf16 %v2202_v16, %v2198_v12 }
 0x479   :  { %v2206_v21 = vpop.eup %2205  ;;  %v1952_v23 = vpack.c.bf16 %v2204_v19, %v2200_v13  ;;  %v1543_v24 = vpop.f32.mrb[16].mxu1 }
 0x47a   :  { %v1586_v26 = vpop.f32.mrb[16].mxu0  ;;  %v2208_v27 = vpop.eup %2207  ;;  %1755 = vst [vmem:[%s2548_s12] sm:$0xff] %v1951_v20  ;;  %v1544_v22 = vadd.f32 %v1543_v24, %v1082_v14 }
 0x47b   :  { %v1587_v28 = vadd.f32 %v1586_v26, %v1090_v15  ;;  %v1545_v29 = vpop.f32.mrb[17].mxu1  ;;  %v1588_v57 = vpop.f32.mrb[17].mxu0  ;;  %1756 = vst [vmem:[%s2548_s12 + $0x8] sm:$0xff] %v1952_v23 }
 0x47c   :  { %v2210_v30 = vpop.eup %2209  ;;  %v1546_v25 = vadd.f32 %v1545_v29, %v1086_v17  ;;  %v1589_v31 = vadd.f32 %v1588_v57, %v1094_v18  ;;  %v1547_v32 = vpop.f32.mrb[18].mxu1  ;;  %v1931_v36 = vmul.f32 -1.442695, %v1544_v22 }
 0x47d   :  { %v1590_v33 = vpop.f32.mrb[18].mxu0  ;;  %v2212_v34 = vpop.eup %2211  ;;  %v1955_v35 = vpack.c.bf16 %v2210_v30, %v2206_v21  ;;  %v1933_v37 = vmul.f32 -1.442695, %v1587_v28  ;;  %v1548_v38 = vadd.f32 %v1547_v32, %v1082_v14 }
 0x47e   :  { %v1549_v39 = vpop.f32.mrb[19].mxu1  ;;  %v1592_v40 = vpop.f32.mrb[19].mxu0  ;;  %v1956_v41 = vpack.c.bf16 %v2212_v34, %v2208_v27  ;;  %v1932_v42 = vmul.f32 -1.442695, %v1546_v25  ;;  %v1934_v43 = vmul.f32 -1.442695, %v1589_v31  ;;  %v1591_v44 = vadd.f32 %v1590_v33, %v1090_v15 }
 0x47f   :  { %1759 = vst [vmem:[%s2548_s12 + $0x20] sm:$0xff] %v1955_v35  ;;  %2213 = vpow2.f32 %v1931_v36  ;;  %v1939_v45 = vmul.f32 -1.442695, %v1548_v38  ;;  %v1550_v46 = vadd.f32 %v1549_v39, %v1086_v17  ;;  %v1593_v47 = vadd.f32 %v1592_v40, %v1094_v18 }
 0x480   :  { %1760 = vst [vmem:[%s2548_s12 + $0x28] sm:$0xff] %v1956_v41  ;;  %2215 = vpow2.f32 %v1933_v37  ;;  %v1941_v48 = vmul.f32 -1.442695, %v1591_v44 }
 0x481   :  { %2217 = vpow2.f32 %v1932_v42  ;;  %v1940_v49 = vmul.f32 -1.442695, %v1550_v46  ;;  %v1942_v50 = vmul.f32 -1.442695, %v1593_v47 }
 0x482   :  { %2219 = vpow2.f32 %v1934_v43 }
 0x483   :  { %2221 = vpow2.f32 %v1939_v45 }
 0x484   :  { %2223 = vpow2.f32 %v1941_v48 }
 0x485   :  { %2225 = vpow2.f32 %v1940_v49 }
 0x486   :  { %2227 = vpow2.f32 %v1942_v50 }
 0x489   :  { %v2214_v51 = vpop.eup %2213 }
 0x48a   :  { %v2216_v52 = vpop.eup %2215  ;;  %v1647_v53 = vadd.f32 1.0, %v2214_v51 }
 0x48b   :  { %v2218_v54 = vpop.eup %2217  ;;  %v1649_v55 = vadd.f32 1.0, %v2216_v52 }
 0x48c   :  { %v2220_v56 = vpop.eup %2219  ;;  %2229 = vrcp.f32 %v1647_v53  ;;  %v1648_v58 = vadd.f32 1.0, %v2218_v54 }
 0x48d   :  { %v2222_v59 = vpop.eup %2221  ;;  %2231 = vrcp.f32 %v1649_v55  ;;  %v1650_v60 = vadd.f32 1.0, %v2220_v56 }
 0x48e   :  { %v2224_v61 = vpop.eup %2223  ;;  %2233 = vrcp.f32 %v1648_v58  ;;  %v1655_v62 = vadd.f32 1.0, %v2222_v59 }
 0x48f   :  { %v2226_v63 = vpop.eup %2225  ;;  %2235 = vrcp.f32 %v1650_v60  ;;  %v1657_v0 = vadd.f32 1.0, %v2224_v61 }
 0x490   :  { %v2228_v1 = vpop.eup %2227  ;;  %2237 = vrcp.f32 %v1655_v62  ;;  %v1656_v2 = vadd.f32 1.0, %v2226_v63 }
 0x491   :  { %2239 = vrcp.f32 %v1657_v0  ;;  %v1658_v3 = vadd.f32 1.0, %v2228_v1 }
 0x492   :  { %2241 = vrcp.f32 %v1656_v2 }
 0x493   :  { %2243 = vrcp.f32 %v1658_v3 }
 0x496   :  { %v2230_v4 = vpop.eup %2229 }
 0x497   :  { %v2232_v5 = vpop.eup %2231 }
 0x498   :  { %v2234_v6 = vpop.eup %2233 }
 0x499   :  { %v2236_v7 = vpop.eup %2235  ;;  %v1953_v8 = vpack.c.bf16 %v2234_v6, %v2230_v4 }
 0x49a   :  { %v2238_v9 = vpop.eup %2237  ;;  %v1954_v10 = vpack.c.bf16 %v2236_v7, %v2232_v5 }
 0x49b   :  { %v2240_v11 = vpop.eup %2239  ;;  %1757 = vst [vmem:[%s2548_s12 + $0x10] sm:$0xff] %v1953_v8 }
 0x49c   :  { %v2242_v12 = vpop.eup %2241  ;;  %1758 = vst [vmem:[%s2548_s12 + $0x18] sm:$0xff] %v1954_v10 }
 0x49d   :  { %v2244_v13 = vpop.eup %2243  ;;  %v1957_v14 = vpack.c.bf16 %v2242_v12, %v2238_v9 }
 0x49e   :  { %v1958_v15 = vpack.c.bf16 %v2244_v13, %v2240_v11 }
 0x49f   :  { %1761 = vst [vmem:[%s2548_s12 + $0x30] sm:$0xff] %v1957_v14 }
 0x4a0   :  { %1762 = vst [vmem:[%s2548_s12 + $0x38] sm:$0xff] %v1958_v15 }
 0x4a1   :  { %1775 = vsyncpa [#allocation3], 1 }
 0x4a2   :  { %1776 = vsyncpa [#allocation5], 1 }

</bundles_post_ra>
